<compile_context>
chip_gen: v7x
topology: tpu7x:2x2x1
jax: 0.10.0
libtpu: 0.0.40
codegen_flags: <defaults>
</compile_context>

<pallas_src>
import functools

import jax
import jax.numpy as jnp
from jax import lax
from jax.experimental import pallas as pl
from jax.experimental.pallas import tpu as pltpu


def lstm_fc_kernel(xg_ref, whh_ref, wfc_ref, bfc_ref, out_ref, h_scr, c_scr):
    """One time-chunk of the LSTM recurrence (+ final Linear on the last chunk).

    xg_ref  : (TC, Bp, 8H) f32  precomputed x@W_ih + b, lanes [ i | 0 | g | 0 | f | 0 | o | 0 ]
    whh_ref : (4H, 8H)     bf16 recurrent weights in the same column layout; rows [H,4H) zero
    wfc_ref : (4H, O)      bf16 fc weights; rows [H,4H) zero
    bfc_ref : (1, O)       f32  fc bias
    out_ref : (Bp, O)      f32  fc(h_T)
    h_scr   : (Bp, 4H)     f32  recurrent state (true h in lanes [0,H)), persists across grid
    c_scr   : (Bp, 4H)     f32  cell state      (true c in lanes [0,H)), persists across grid
    """
    TC = xg_ref.shape[0]
    G2 = xg_ref.shape[-1]
    G = G2 // 2          # 4H
    H = G // 4

    @pl.when(pl.program_id(0) == 0)
    def _init():
        h_scr[...] = jnp.zeros_like(h_scr)
        c_scr[...] = jnp.zeros_like(c_scr)

    whh = whh_ref[...]   # hoist the recurrent-weight load out of the unrolled loop

    def step(t, carry):
        h, c = carry
        # Single recurrent MXU matmul per step (input projection + bias already in xg).
        gates = xg_ref[t] + jnp.dot(h.astype(whh.dtype), whh,
                                    preferred_element_type=jnp.float32)   # (Bp, 8H)
        g1 = gates[:, :G]                    # [ i | 0 | g | 0 ]  (vreg-aligned slice)
        g2 = gates[:, G:]                    # [ f | 0 | o | 0 ]
        s1 = jax.nn.sigmoid(g1)              # sigma(i) in lanes [0,H)          (EUP, full vreg)
        t1 = jnp.tanh(g1)                    # tanh(g)  in lanes [2H,3H)
        s2 = jax.nn.sigmoid(g2)              # sigma(f) in [0,H), sigma(o) in [2H,3H)
        tanh_g = pltpu.roll(t1, shift=2 * H, axis=1)   # tanh(g)  -> lanes [0,H)  (XLU)
        sig_o = pltpu.roll(s2, shift=2 * H, axis=1)    # sigma(o) -> lanes [0,H)
        c = s2 * c + s1 * tanh_g             # lanes [0,H): sigma(f)*c + sigma(i)*tanh(g)
        h = sig_o * jnp.tanh(c)              # lanes [0,H): sigma(o)*tanh(c); rest bounded junk
        return h, c

    h, c = lax.fori_loop(0, TC, step, (h_scr[...], c_scr[...]), unroll=True)
    h_scr[...] = h
    c_scr[...] = c

    @pl.when(pl.program_id(0) == pl.num_programs(0) - 1)
    def _final():
        out_ref[...] = (jnp.dot(h.astype(wfc_ref.dtype), wfc_ref[...],
                                preferred_element_type=jnp.float32)
                        + bfc_ref[...]).astype(out_ref.dtype)


@functools.partial(jax.jit, static_argnames=("time_chunk",))
def bandwidth_allocator_forward(x, params, *, time_chunk=None):
    """x: (B, S, I) batch_first, like the PyTorch module. Returns (B, O)."""
    w_ih, w_hh = params["w_ih"], params["w_hh"]          # (4H, I), (4H, H)
    b_ih, b_hh = params["b_ih"], params["b_hh"]          # (4H,), (4H,)
    w_fc, b_fc = params["w_fc"], params["b_fc"]          # (O, H), (O,)

    B, S, I = x.shape
    H = w_hh.shape[1]
    O = w_fc.shape[0]
    G = 4 * H                 # gate width (128 for H=32 -> one vreg)
    G2 = 2 * G                # doubled, rotation-direction-safe gate layout

    Bp = ((B + 7) // 8) * 8   # pad batch to a sublane multiple
    if time_chunk is None:
        time_chunk = 4 if (S % 4 == 0 and S > 4) else S
    assert S % time_chunk == 0, "time_chunk must divide the sequence length"
    n_chunks = S // time_chunk

    f32, bf16 = jnp.float32, jnp.bfloat16

    # ---- hoisted input projection: one big bf16 matmul, f32 accumulate -------
    bias = (b_ih + b_hh).astype(f32)                                        # (4H,)
    xg = jnp.einsum("bsi,ig->bsg", x.astype(bf16), w_ih.T.astype(bf16),
                    preferred_element_type=f32) + bias                      # (B,S,4H) i|f|g|o
    xg = jnp.transpose(xg, (1, 0, 2))                                       # (S,B,4H) time-major
    xg = jnp.pad(xg, ((0, 0), (0, Bp - B), (0, 0)))                         # (S,Bp,4H)

    # scatter standard gate order into the 8H layout [ i | 0 | g | 0 | f | 0 | o | 0 ]
    xg_big = jnp.zeros((S, Bp, G2), f32)
    xg_big = xg_big.at[..., 0:H].set(xg[..., 0:H])                          # i
    xg_big = xg_big.at[..., 2 * H:3 * H].set(xg[..., 2 * H:3 * H])          # g
    xg_big = xg_big.at[..., G:G + H].set(xg[..., H:2 * H])                  # f
    xg_big = xg_big.at[..., G + 2 * H:G + 3 * H].set(xg[..., 3 * H:4 * H])  # o

    whh_t = w_hh.T.astype(bf16)                                             # (H,4H) i|f|g|o
    whh_big = jnp.zeros((G, G2), bf16)                                      # rows [H,4H) stay 0
    whh_big = whh_big.at[:H, 0:H].set(whh_t[:, 0:H])
    whh_big = whh_big.at[:H, 2 * H:3 * H].set(whh_t[:, 2 * H:3 * H])
    whh_big = whh_big.at[:H, G:G + H].set(whh_t[:, H:2 * H])
    whh_big = whh_big.at[:H, G + 2 * H:G + 3 * H].set(whh_t[:, 3 * H:4 * H])

    wfc_pad = jnp.zeros((G, O), bf16).at[:H, :].set(w_fc.T.astype(bf16))    # (4H, O)
    bfc = b_fc.astype(f32).reshape(1, O)

    # VMEM footprint is tiny here; for very long sequences the xg stream stays
    # chunked over the grid, so only (time_chunk, Bp, 8H) is resident at once.
    out = pl.pallas_call(
        lstm_fc_kernel,
        out_shape=jax.ShapeDtypeStruct((Bp, O), f32),
        grid=(n_chunks,),
        in_specs=[
            pl.BlockSpec((time_chunk, Bp, G2), lambda s: (s, 0, 0)),  # stream xg chunks
            pl.BlockSpec((G, G2), lambda s: (0, 0)),                  # W_hh resident
            pl.BlockSpec((G, O), lambda s: (0, 0)),                   # W_fc resident
            pl.BlockSpec((1, O), lambda s: (0, 0)),                   # fc bias
        ],
        out_specs=pl.BlockSpec((Bp, O), lambda s: (0, 0)),
        scratch_shapes=[
            pltpu.VMEM((Bp, G), f32),   # h state (persists across grid steps)
            pltpu.VMEM((Bp, G), f32),   # c state
        ],
        compiler_params=pltpu.CompilerParams(
            dimension_semantics=("arbitrary",),   # sequential recurrence over time
        ),
    )(xg_big, whh_big, wfc_pad, bfc)

    return out[:B]


def _reference_forward(x, params):
    """Pure-JAX f32 reference with PyTorch LSTM semantics, for verification."""
    w_ih, w_hh, b_ih, b_hh, w_fc, b_fc = (
        params["w_ih"], params["w_hh"], params["b_ih"],
        params["b_hh"], params["w_fc"], params["b_fc"])
    B, S, I = x.shape
    H = w_hh.shape[1]
    h = jnp.zeros((B, H), jnp.float32)
    c = jnp.zeros((B, H), jnp.float32)
    for t in range(S):
        gates = x[:, t, :] @ w_ih.T + b_ih + h @ w_hh.T + b_hh
        i = jax.nn.sigmoid(gates[:, 0 * H:1 * H])
        f = jax.nn.sigmoid(gates[:, 1 * H:2 * H])
        g = jnp.tanh(gates[:, 2 * H:3 * H])
        o = jax.nn.sigmoid(gates[:, 3 * H:4 * H])
        c = f * c + i * g
        h = o * jnp.tanh(c)
    return h @ w_fc.T + b_fc


def init_params(key, input_size, hidden_size, output_size):
    """Deterministic parameter init matching PyTorch parameter shapes."""
    k1, k2, k3, k4, k5, k6 = jax.random.split(key, 6)
    s = 1.0 / jnp.sqrt(hidden_size)
    return {
        "w_ih": jax.random.uniform(k1, (4 * hidden_size, input_size),
                                   jnp.float32, -s, s),
        "w_hh": jax.random.uniform(k2, (4 * hidden_size, hidden_size),
                                   jnp.float32, -s, s),
        "b_ih": jax.random.uniform(k3, (4 * hidden_size,), jnp.float32, -s, s),
        "b_hh": jax.random.uniform(k4, (4 * hidden_size,), jnp.float32, -s, s),
        "w_fc": jax.random.uniform(k5, (output_size, hidden_size),
                                   jnp.float32, -s, s),
        "b_fc": jax.random.uniform(k6, (output_size,), jnp.float32, -s, s),
    }


if __name__ == "__main__":
    INPUT, HIDDEN, OUTPUT = 16, 32, 8
    BATCH, SEQ = 4, 8

    key = jax.random.PRNGKey(0)
    kx, kp = jax.random.split(key)
    x = jax.random.normal(kx, (BATCH, SEQ, INPUT), jnp.float32)
    params = init_params(kp, INPUT, HIDDEN, OUTPUT)

    out = bandwidth_allocator_forward(x, params)
    out = jax.block_until_ready(out)

    ref = _reference_forward(x, params)
    assert out.shape == (BATCH, OUTPUT)
    # bf16 MXU inputs vs. an all-f32 reference -> loosened tolerance (gate
    # nonlinearities, c/h and all accumulations remain f32 in the kernel).
    assert jnp.allclose(out, ref, atol=3e-2, rtol=3e-2), "mismatch vs reference"

    print("KERNEL_OK")
</pallas_src>

<mosaic_0001>
module attributes {stable_mosaic.version = 11 : i64} {
  func.func @lstm_fc_kernel(%arg0: i32, %arg1: memref<4x8x256xf32, #tpu.memory_space<vmem>>, %arg2: memref<128x256xbf16, #tpu.memory_space<vmem>>, %arg3: memref<128x8xbf16, #tpu.memory_space<vmem>>, %arg4: memref<1x8xf32, #tpu.memory_space<vmem>>, %arg5: memref<8x8xf32, #tpu.memory_space<vmem>>, %arg6: memref<8x128xf32, #tpu.memory_space<vmem>>, %arg7: memref<8x128xf32, #tpu.memory_space<vmem>>) attributes {dimension_semantics = [#tpu.dimension_semantics<arbitrary>], iteration_bounds = array<i64: 2>, scalar_prefetch = 0 : i64, scratch_operands = 2 : i64, tpu.core_type = #tpu.core_type<tc>, window_params = [{transform_indices = @transform_0, window_bounds = array<i64: 4, 8, 256>}, {pipeline_mode = #tpu.pipeline_mode<synchronous>, transform_indices = @transform_1, window_bounds = array<i64: 128, 256>}, {pipeline_mode = #tpu.pipeline_mode<synchronous>, transform_indices = @transform_2, window_bounds = array<i64: 128, 8>}, {pipeline_mode = #tpu.pipeline_mode<synchronous>, transform_indices = @transform_3, window_bounds = array<i64: 1, 8>}, {pipeline_mode = #tpu.pipeline_mode<synchronous>, transform_indices = @transform_4, window_bounds = array<i64: 8, 8>}]} {
    %c0_i32 = arith.constant 0 : i32
    %0 = arith.cmpi eq, %arg0, %c0_i32 : i32
    %1 = arith.extui %0 : i1 to i32
    %c0_i32_0 = arith.constant 0 : i32
    %2 = arith.cmpi ne, %1, %c0_i32_0 : i32
    scf.if %2 {
      %cst_39 = arith.constant 0.000000e+00 : f32
      %115 = vector.broadcast %cst_39 : f32 to vector<8x128xf32>
      %c0_40 = arith.constant 0 : index
      %c0_41 = arith.constant 0 : index
      %116 = vector.load %arg6[%c0_40, %c0_41] : memref<8x128xf32, #tpu.memory_space<vmem>>, vector<8x128xf32>
      tpu.vector_store %arg6[%c0_40, %c0_41], %115 {strides = array<i32>} : memref<8x128xf32, #tpu.memory_space<vmem>>, vector<8x128xf32>,
      %cst_42 = arith.constant 0.000000e+00 : f32
      %117 = vector.broadcast %cst_42 : f32 to vector<8x128xf32>
      %c0_43 = arith.constant 0 : index
      %c0_44 = arith.constant 0 : index
      %118 = vector.load %arg7[%c0_43, %c0_44] : memref<8x128xf32, #tpu.memory_space<vmem>>, vector<8x128xf32>
      tpu.vector_store %arg7[%c0_43, %c0_44], %117 {strides = array<i32>} : memref<8x128xf32, #tpu.memory_space<vmem>>, vector<8x128xf32>,
    } else {
    }
    %c0 = arith.constant 0 : index
    %c0_1 = arith.constant 0 : index
    %3 = vector.load %arg2[%c0, %c0_1] : memref<128x256xbf16, #tpu.memory_space<vmem>>, vector<128x256xbf16>
    %c0_2 = arith.constant 0 : index
    %c0_3 = arith.constant 0 : index
    %4 = vector.load %arg6[%c0_2, %c0_3] : memref<8x128xf32, #tpu.memory_space<vmem>>, vector<8x128xf32>
    %c0_4 = arith.constant 0 : index
    %c0_5 = arith.constant 0 : index
    %5 = vector.load %arg7[%c0_4, %c0_5] : memref<8x128xf32, #tpu.memory_space<vmem>>, vector<8x128xf32>
    %c0_i32_6 = arith.constant 0 : i32
    %6 = arith.index_cast %c0_i32_6 : i32 to index
    %c0_7 = arith.constant 0 : index
    %c0_8 = arith.constant 0 : index
    %7 = vector.load %arg1[%6, %c0_7, %c0_8] : memref<4x8x256xf32, #tpu.memory_space<vmem>>, vector<1x8x256xf32>
    %8 = vector.shape_cast %7 : vector<1x8x256xf32> to vector<8x256xf32>
    %9 = arith.truncf %4 : vector<8x128xf32> to vector<8x128xbf16>
    %cst = arith.constant dense<0.000000e+00> : vector<8x256xf32>
    %10 = tpu.matmul %9, %3, %cst {dimension_numbers = #tpu.dot_dimension_numbers<[1], [0], [0], [1], [0, 0, 1, 1], [], []>} : vector<8x128xbf16>, vector<128x256xbf16>, vector<8x256xf32> -> vector<8x256xf32>
    %11 = arith.addf %8, %10 : vector<8x256xf32>
    %12 = vector.extract_strided_slice %11 {offsets = [0, 0], sizes = [8, 128], strides = [1, 1]} : vector<8x256xf32> to vector<8x128xf32>
    %13 = vector.extract_strided_slice %11 {offsets = [0, 128], sizes = [8, 128], strides = [1, 1]} : vector<8x256xf32> to vector<8x128xf32>
    %14 = arith.negf %12 : vector<8x128xf32>
    %15 = math.exp %14 : vector<8x128xf32>
    %cst_9 = arith.constant 1.000000e+00 : f32
    %16 = vector.broadcast %cst_9 : f32 to vector<8x128xf32>
    %17 = arith.addf %16, %15 : vector<8x128xf32>
    %18 = arith.divf %16, %17 : vector<8x128xf32>
    %19 = math.tanh %12 : vector<8x128xf32>
    %20 = arith.negf %13 : vector<8x128xf32>
    %21 = math.exp %20 : vector<8x128xf32>
    %cst_10 = arith.constant 1.000000e+00 : f32
    %22 = vector.broadcast %cst_10 : f32 to vector<8x128xf32>
    %23 = arith.addf %22, %21 : vector<8x128xf32>
    %24 = arith.divf %22, %23 : vector<8x128xf32>
    %c64_i32 = arith.constant 64 : i32
    %25 = tpu.dynamic_rotate %19 by %c64_i32 dim 1 : vector<8x128xf32>, i32 -> vector<8x128xf32>
    %c64_i32_11 = arith.constant 64 : i32
    %26 = tpu.dynamic_rotate %24 by %c64_i32_11 dim 1 : vector<8x128xf32>, i32 -> vector<8x128xf32>
    %27 = arith.mulf %24, %5 : vector<8x128xf32>
    %28 = arith.mulf %18, %25 : vector<8x128xf32>
    %29 = arith.addf %27, %28 : vector<8x128xf32>
    %30 = math.tanh %29 : vector<8x128xf32>
    %31 = arith.mulf %26, %30 : vector<8x128xf32>
    %c1_i32 = arith.constant 1 : i32
    %32 = arith.index_cast %c1_i32 : i32 to index
    %c0_12 = arith.constant 0 : index
    %c0_13 = arith.constant 0 : index
    %33 = vector.load %arg1[%32, %c0_12, %c0_13] : memref<4x8x256xf32, #tpu.memory_space<vmem>>, vector<1x8x256xf32>
    %34 = vector.shape_cast %33 : vector<1x8x256xf32> to vector<8x256xf32>
    %35 = arith.truncf %31 : vector<8x128xf32> to vector<8x128xbf16>
    %cst_14 = arith.constant dense<0.000000e+00> : vector<8x256xf32>
    %36 = tpu.matmul %35, %3, %cst_14 {dimension_numbers = #tpu.dot_dimension_numbers<[1], [0], [0], [1], [0, 0, 1, 1], [], []>} : vector<8x128xbf16>, vector<128x256xbf16>, vector<8x256xf32> -> vector<8x256xf32>
    %37 = arith.addf %34, %36 : vector<8x256xf32>
    %38 = vector.extract_strided_slice %37 {offsets = [0, 0], sizes = [8, 128], strides = [1, 1]} : vector<8x256xf32> to vector<8x128xf32>
    %39 = vector.extract_strided_slice %37 {offsets = [0, 128], sizes = [8, 128], strides = [1, 1]} : vector<8x256xf32> to vector<8x128xf32>
    %40 = arith.negf %38 : vector<8x128xf32>
    %41 = math.exp %40 : vector<8x128xf32>
    %cst_15 = arith.constant 1.000000e+00 : f32
    %42 = vector.broadcast %cst_15 : f32 to vector<8x128xf32>
    %43 = arith.addf %42, %41 : vector<8x128xf32>
    %44 = arith.divf %42, %43 : vector<8x128xf32>
    %45 = math.tanh %38 : vector<8x128xf32>
    %46 = arith.negf %39 : vector<8x128xf32>
    %47 = math.exp %46 : vector<8x128xf32>
    %cst_16 = arith.constant 1.000000e+00 : f32
    %48 = vector.broadcast %cst_16 : f32 to vector<8x128xf32>
    %49 = arith.addf %48, %47 : vector<8x128xf32>
    %50 = arith.divf %48, %49 : vector<8x128xf32>
    %c64_i32_17 = arith.constant 64 : i32
    %51 = tpu.dynamic_rotate %45 by %c64_i32_17 dim 1 : vector<8x128xf32>, i32 -> vector<8x128xf32>
    %c64_i32_18 = arith.constant 64 : i32
    %52 = tpu.dynamic_rotate %50 by %c64_i32_18 dim 1 : vector<8x128xf32>, i32 -> vector<8x128xf32>
    %53 = arith.mulf %50, %29 : vector<8x128xf32>
    %54 = arith.mulf %44, %51 : vector<8x128xf32>
    %55 = arith.addf %53, %54 : vector<8x128xf32>
    %56 = math.tanh %55 : vector<8x128xf32>
    %57 = arith.mulf %52, %56 : vector<8x128xf32>
    %c2_i32 = arith.constant 2 : i32
    %58 = arith.index_cast %c2_i32 : i32 to index
    %c0_19 = arith.constant 0 : index
    %c0_20 = arith.constant 0 : index
    %59 = vector.load %arg1[%58, %c0_19, %c0_20] : memref<4x8x256xf32, #tpu.memory_space<vmem>>, vector<1x8x256xf32>
    %60 = vector.shape_cast %59 : vector<1x8x256xf32> to vector<8x256xf32>
    %61 = arith.truncf %57 : vector<8x128xf32> to vector<8x128xbf16>
    %cst_21 = arith.constant dense<0.000000e+00> : vector<8x256xf32>
    %62 = tpu.matmul %61, %3, %cst_21 {dimension_numbers = #tpu.dot_dimension_numbers<[1], [0], [0], [1], [0, 0, 1, 1], [], []>} : vector<8x128xbf16>, vector<128x256xbf16>, vector<8x256xf32> -> vector<8x256xf32>
    %63 = arith.addf %60, %62 : vector<8x256xf32>
    %64 = vector.extract_strided_slice %63 {offsets = [0, 0], sizes = [8, 128], strides = [1, 1]} : vector<8x256xf32> to vector<8x128xf32>
    %65 = vector.extract_strided_slice %63 {offsets = [0, 128], sizes = [8, 128], strides = [1, 1]} : vector<8x256xf32> to vector<8x128xf32>
    %66 = arith.negf %64 : vector<8x128xf32>
    %67 = math.exp %66 : vector<8x128xf32>
    %cst_22 = arith.constant 1.000000e+00 : f32
    %68 = vector.broadcast %cst_22 : f32 to vector<8x128xf32>
    %69 = arith.addf %68, %67 : vector<8x128xf32>
    %70 = arith.divf %68, %69 : vector<8x128xf32>
    %71 = math.tanh %64 : vector<8x128xf32>
    %72 = arith.negf %65 : vector<8x128xf32>
    %73 = math.exp %72 : vector<8x128xf32>
    %cst_23 = arith.constant 1.000000e+00 : f32
    %74 = vector.broadcast %cst_23 : f32 to vector<8x128xf32>
    %75 = arith.addf %74, %73 : vector<8x128xf32>
    %76 = arith.divf %74, %75 : vector<8x128xf32>
    %c64_i32_24 = arith.constant 64 : i32
    %77 = tpu.dynamic_rotate %71 by %c64_i32_24 dim 1 : vector<8x128xf32>, i32 -> vector<8x128xf32>
    %c64_i32_25 = arith.constant 64 : i32
    %78 = tpu.dynamic_rotate %76 by %c64_i32_25 dim 1 : vector<8x128xf32>, i32 -> vector<8x128xf32>
    %79 = arith.mulf %76, %55 : vector<8x128xf32>
    %80 = arith.mulf %70, %77 : vector<8x128xf32>
    %81 = arith.addf %79, %80 : vector<8x128xf32>
    %82 = math.tanh %81 : vector<8x128xf32>
    %83 = arith.mulf %78, %82 : vector<8x128xf32>
    %c3_i32 = arith.constant 3 : i32
    %84 = arith.index_cast %c3_i32 : i32 to index
    %c0_26 = arith.constant 0 : index
    %c0_27 = arith.constant 0 : index
    %85 = vector.load %arg1[%84, %c0_26, %c0_27] : memref<4x8x256xf32, #tpu.memory_space<vmem>>, vector<1x8x256xf32>
    %86 = vector.shape_cast %85 : vector<1x8x256xf32> to vector<8x256xf32>
    %87 = arith.truncf %83 : vector<8x128xf32> to vector<8x128xbf16>
    %cst_28 = arith.constant dense<0.000000e+00> : vector<8x256xf32>
    %88 = tpu.matmul %87, %3, %cst_28 {dimension_numbers = #tpu.dot_dimension_numbers<[1], [0], [0], [1], [0, 0, 1, 1], [], []>} : vector<8x128xbf16>, vector<128x256xbf16>, vector<8x256xf32> -> vector<8x256xf32>
    %89 = arith.addf %86, %88 : vector<8x256xf32>
    %90 = vector.extract_strided_slice %89 {offsets = [0, 0], sizes = [8, 128], strides = [1, 1]} : vector<8x256xf32> to vector<8x128xf32>
    %91 = vector.extract_strided_slice %89 {offsets = [0, 128], sizes = [8, 128], strides = [1, 1]} : vector<8x256xf32> to vector<8x128xf32>
    %92 = arith.negf %90 : vector<8x128xf32>
    %93 = math.exp %92 : vector<8x128xf32>
    %cst_29 = arith.constant 1.000000e+00 : f32
    %94 = vector.broadcast %cst_29 : f32 to vector<8x128xf32>
    %95 = arith.addf %94, %93 : vector<8x128xf32>
    %96 = arith.divf %94, %95 : vector<8x128xf32>
    %97 = math.tanh %90 : vector<8x128xf32>
    %98 = arith.negf %91 : vector<8x128xf32>
    %99 = math.exp %98 : vector<8x128xf32>
    %cst_30 = arith.constant 1.000000e+00 : f32
    %100 = vector.broadcast %cst_30 : f32 to vector<8x128xf32>
    %101 = arith.addf %100, %99 : vector<8x128xf32>
    %102 = arith.divf %100, %101 : vector<8x128xf32>
    %c64_i32_31 = arith.constant 64 : i32
    %103 = tpu.dynamic_rotate %97 by %c64_i32_31 dim 1 : vector<8x128xf32>, i32 -> vector<8x128xf32>
    %c64_i32_32 = arith.constant 64 : i32
    %104 = tpu.dynamic_rotate %102 by %c64_i32_32 dim 1 : vector<8x128xf32>, i32 -> vector<8x128xf32>
    %105 = arith.mulf %102, %81 : vector<8x128xf32>
    %106 = arith.mulf %96, %103 : vector<8x128xf32>
    %107 = arith.addf %105, %106 : vector<8x128xf32>
    %108 = math.tanh %107 : vector<8x128xf32>
    %109 = arith.mulf %104, %108 : vector<8x128xf32>
    %c4_i32 = arith.constant 4 : i32
    %c0_33 = arith.constant 0 : index
    %c0_34 = arith.constant 0 : index
    %110 = vector.load %arg6[%c0_33, %c0_34] : memref<8x128xf32, #tpu.memory_space<vmem>>, vector<8x128xf32>
    tpu.vector_store %arg6[%c0_33, %c0_34], %109 {strides = array<i32>} : memref<8x128xf32, #tpu.memory_space<vmem>>, vector<8x128xf32>,
    %c0_35 = arith.constant 0 : index
    %c0_36 = arith.constant 0 : index
    %111 = vector.load %arg7[%c0_35, %c0_36] : memref<8x128xf32, #tpu.memory_space<vmem>>, vector<8x128xf32>
    tpu.vector_store %arg7[%c0_35, %c0_36], %107 {strides = array<i32>} : memref<8x128xf32, #tpu.memory_space<vmem>>, vector<8x128xf32>,
    %c1_i32_37 = arith.constant 1 : i32
    %112 = arith.cmpi eq, %arg0, %c1_i32_37 : i32
    %113 = arith.extui %112 : i1 to i32
    %c0_i32_38 = arith.constant 0 : i32
    %114 = arith.cmpi ne, %113, %c0_i32_38 : i32
    scf.if %114 {
      %115 = arith.truncf %109 : vector<8x128xf32> to vector<8x128xbf16>
      %c0_39 = arith.constant 0 : index
      %c0_40 = arith.constant 0 : index
      %116 = vector.load %arg3[%c0_39, %c0_40] : memref<128x8xbf16, #tpu.memory_space<vmem>>, vector<128x8xbf16>
      %cst_41 = arith.constant dense<0.000000e+00> : vector<8x8xf32>
      %117 = tpu.matmul %115, %116, %cst_41 {dimension_numbers = #tpu.dot_dimension_numbers<[1], [0], [0], [1], [0, 0, 1, 1], [], []>} : vector<8x128xbf16>, vector<128x8xbf16>, vector<8x8xf32> -> vector<8x8xf32>
      %c0_42 = arith.constant 0 : index
      %c0_43 = arith.constant 0 : index
      %118 = vector.load %arg4[%c0_42, %c0_43] : memref<1x8xf32, #tpu.memory_space<vmem>>, vector<1x8xf32>
      %119 = vector.broadcast %118 : vector<1x8xf32> to vector<8x8xf32>
      %120 = arith.addf %117, %119 : vector<8x8xf32>
      %c0_44 = arith.constant 0 : index
      %c0_45 = arith.constant 0 : index
      %121 = vector.load %arg5[%c0_44, %c0_45] : memref<8x8xf32, #tpu.memory_space<vmem>>, vector<8x8xf32>
      tpu.vector_store %arg5[%c0_44, %c0_45], %120 {strides = array<i32>} : memref<8x8xf32, #tpu.memory_space<vmem>>, vector<8x8xf32>,
    } else {
    }
    return
  }
  func.func @transform_0(%arg0: i32) -> (i32, i32, i32) {
    %c0_i32 = arith.constant 0 : i32
    %c0_i32_0 = arith.constant 0 : i32
    %c0_i32_1 = arith.constant 0 : i32
    return %arg0, %c0_i32, %c0_i32_0 : i32, i32, i32
  }
  func.func @transform_1(%arg0: i32) -> (i32, i32) {
    %c0_i32 = arith.constant 0 : i32
    %c0_i32_0 = arith.constant 0 : i32
    %c0_i32_1 = arith.constant 0 : i32
    return %c0_i32, %c0_i32_0 : i32, i32
  }
  func.func @transform_2(%arg0: i32) -> (i32, i32) {
    %c0_i32 = arith.constant 0 : i32
    %c0_i32_0 = arith.constant 0 : i32
    %c0_i32_1 = arith.constant 0 : i32
    return %c0_i32, %c0_i32_0 : i32, i32
  }
  func.func @transform_3(%arg0: i32) -> (i32, i32) {
    %c0_i32 = arith.constant 0 : i32
    %c0_i32_0 = arith.constant 0 : i32
    %c0_i32_1 = arith.constant 0 : i32
    return %c0_i32, %c0_i32_0 : i32, i32
  }
  func.func @transform_4(%arg0: i32) -> (i32, i32) {
    %c0_i32 = arith.constant 0 : i32
    %c0_i32_0 = arith.constant 0 : i32
    %c0_i32_1 = arith.constant 0 : i32
    return %c0_i32, %c0_i32_0 : i32, i32
  }
}

</mosaic_0001>

<bundles_post_ra>
// kernel: bandwidth_allocator_forward.1
= control target key start
LH: loop header
LB: loop body
LE: loop exit
PB: predicated region body
PF: predicated region fallthrough
CT: control target
= control target key end

     0   :  { %s927_s15 = smov 0   ;;  %s1136_s0 = inlined_call_operand.vmem [shape: f32[8,8,256], index: 0, kind: input, shape index: {}]   ;;  %s1137_s1 = inlined_call_operand.vmem [shape: bf16[128,256], index: 1, kind: input, shape index: {}]   ;;  %s1138_s2 = inlined_call_operand.vmem [shape: bf16[128,8], index: 2, kind: input, shape index: {}]   ;;  %s1139_s3 = inlined_call_operand.vmem [shape: f32[1,8], index: 3, kind: input, shape index: {}]   ;;  %s1140_s4 = inlined_call_operand.vmem [shape: f32[8,8], index: 4, kind: output, shape index: {}]  }
   0x1 LB: > { %s933_s16 = sadd.s32 4294967295, %s895_s15   ;;  %p719_p0 = scmp.ge.s32.totalorder %s895_s15, 1  ;;  %s895_s15 = sphi %s927_s15, %s14_s15  }
   0x2   : > { %p159_p1 = scmp.lt.s32.totalorder %s895_s15, 3 }
   0x4   : > { %p160_p2 = pnand %p719_p0, %p159_p1 }
   0x5   : > { %s720_s17 = sshll.u32 (!%p160_p2), %s933_s16, 2  ;;  %p723_p4 = scmp.ne.s32.totalorder (!%p160_p2), %s933_s16, 0 }
   0x6   : > { %163 = sbr.rel (%p160_p2) target bundleno = 1709 (0x6ad), region = 36  ;;  %p182_p3 = scmp.lt.s32.totalorder (!%p160_p2), %s720_s17, 7 }
   0xd   : > { %s1142_s17 = smov (!%p182_p3, %s720_s17), 7  ;;  %192 = sbr.rel (%p723_p4) target bundleno = 20 (0x14), region = 40 }
   0xe   : > { %s766_s18 = sshll.u32 %s1142_s17, 4  ;;  %v897_v0 = vmov (!%p723_p4), 0.0  }
   0xf   : > { %s941_s21 = scalar_lea.vmem %s1136_s0, %s766_s18  ;;  %193 = vst [vmem:[#allocation2] sm:$0xff] (!%p723_p4), %v897_v0  ;;  %194 = vst [vmem:[#allocation3] sm:$0xff] (!%p723_p4), %v897_v0 }
  0x14 PF: > { %v809_v1 = vld [vmem:[%s1137_s1 + $0x4] ss:$8 sps:$4 sm:$0xff]   ;;  %v950_v2 = vld [vmem:[%s1137_s1] ss:$8 sps:$4 sm:$0xff]   ;;  %v898_v3 = vmov 0   ;;  %s899_s5 = smov 64  }
  0x15   : > { %328 = vmatprep.mubr.bf16.mxu0 %v898_v3  ;;  %397 = vmatprep.mubr.bf16.mxu1 %v898_v3  ;;  %v957_v4 = vld [vmem:[%s1137_s1 + $0x14] ss:$8 sps:$4 sm:$0xff]   ;;  %v963_v5 = vld [vmem:[%s1137_s1 + $0x10] ss:$8 sps:$4 sm:$0xff]   ;;  %v970_v6 = vld [vmem:[%s1137_s1 + $0x24] ss:$8 sps:$4 sm:$0xff]  }
  0x16   : > { %296 = vmatprep.subr.bf16.mxu0 %v809_v1  ;;  %365 = vmatprep.subr.bf16.mxu1 %v809_v1  ;;  %v977_v7 = vld [vmem:[%s1137_s1 + $0x20] ss:$8 sps:$4 sm:$0xff]   ;;  %v984_v8 = vld [vmem:[%s1137_s1 + $0x34] ss:$8 sps:$4 sm:$0xff]   ;;  %v991_v9 = vld [vmem:[%s1137_s1 + $0x30] ss:$8 sps:$4 sm:$0xff]  }
  0x17   : > { %297 = vmatpush1.bf16.msra.mxu0 %v950_v2  ;;  %366 = vmatpush1.bf16.msra.mxu1 %v950_v2  ;;  %v998_v10 = vld [vmem:[%s1137_s1 + $0x44] ss:$8 sps:$4 sm:$0xff]   ;;  %v1005_v11 = vld [vmem:[%s1137_s1 + $0x40] ss:$8 sps:$4 sm:$0xff]   ;;  %v1012_v12 = vld [vmem:[%s1137_s1 + $0x54] ss:$8 sps:$4 sm:$0xff]  }
  0x18   : > { %298 = vmatprep.subr.bf16.mxu0 %v957_v4  ;;  %367 = vmatprep.subr.bf16.mxu1 %v957_v4  ;;  %v1019_v13 = vld [vmem:[%s1137_s1 + $0x50] ss:$8 sps:$4 sm:$0xff]   ;;  %v1026_v14 = vld [vmem:[%s1137_s1 + $0x64] ss:$8 sps:$4 sm:$0xff]   ;;  %v1033_v15 = vld [vmem:[%s1137_s1 + $0x60] ss:$8 sps:$4 sm:$0xff]  }
  0x19   : > { %v1040_v16 = vld [vmem:[%s1137_s1 + $0x74] ss:$8 sps:$4 sm:$0xff]   ;;  %v1047_v17 = vld [vmem:[%s1137_s1 + $0x70] ss:$8 sps:$4 sm:$0xff]   ;;  %v211_v18 = vld [vmem:[#allocation2] sm:$0xff]  ;;  %p754_p5 = scmp.ne.s32.totalorder %s933_s16, 1 }
  0x1a   : > { %v215_v19 = vpack.c.bf16 %v211_v18, %v211_v18  ;;  %v213_v20 = vld [vmem:[%s941_s21] sm:$0xff]  ;;  %v214_v21 = vld [vmem:[%s941_s21 + $0x8] sm:$0xff]  ;;  %v742_v46 = vld [vmem:[%s941_s21 + $0x10] sm:$0xff]  ;;  %vm901_vm0 = vmmov (!%p754_p5), 0   ;;  %vm686_vm1 = vcmask (!%p754_p5), 64512  }
  0x1b   : > { %299 = vmatpush1.bf16.msra.mxu0 %v963_v5  ;;  %368 = vmatpush1.bf16.msra.mxu1 %v963_v5  ;;  %v212_v36 = vld [vmem:[#allocation3] sm:$0xff]  ;;  %v743_v47 = vld [vmem:[%s941_s21 + $0x18] sm:$0xff] }
  0x1c   : > { %300 = vmatprep.subr.bf16.mxu0 %v970_v6  ;;  %369 = vmatprep.subr.bf16.mxu1 %v970_v6 }
  0x1f   : > { %301 = vmatpush1.bf16.msra.mxu0 %v977_v7  ;;  %370 = vmatpush1.bf16.msra.mxu1 %v977_v7 }
  0x20   : > { %302 = vmatprep.subr.bf16.mxu0 %v984_v8  ;;  %371 = vmatprep.subr.bf16.mxu1 %v984_v8 }
  0x23   : > { %303 = vmatpush1.bf16.msra.mxu0 %v991_v9  ;;  %372 = vmatpush1.bf16.msra.mxu1 %v991_v9 }
  0x24   : > { %304 = vmatprep.subr.bf16.mxu0 %v998_v10  ;;  %373 = vmatprep.subr.bf16.mxu1 %v998_v10 }
  0x27   : > { %305 = vmatpush1.bf16.msra.mxu0 %v1005_v11  ;;  %374 = vmatpush1.bf16.msra.mxu1 %v1005_v11 }
  0x28   : > { %306 = vmatprep.subr.bf16.mxu0 %v1012_v12  ;;  %375 = vmatprep.subr.bf16.mxu1 %v1012_v12 }
  0x2b   : > { %307 = vmatpush1.bf16.msra.mxu0 %v1019_v13  ;;  %376 = vmatpush1.bf16.msra.mxu1 %v1019_v13 }
  0x2c   : > { %308 = vmatprep.subr.bf16.mxu0 %v1026_v14  ;;  %377 = vmatprep.subr.bf16.mxu1 %v1026_v14 }
  0x2f   : > { %309 = vmatpush1.bf16.msra.mxu0 %v1033_v15  ;;  %378 = vmatpush1.bf16.msra.mxu1 %v1033_v15 }
  0x30   : > { %310 = vmatprep.subr.bf16.mxu0 %v1040_v16  ;;  %379 = vmatprep.subr.bf16.mxu1 %v1040_v16 }
  0x33   : > { %311 = vmatpush1.bf16.msra.mxu0 %v1047_v17  ;;  %380 = vmatpush1.bf16.msra.mxu1 %v1047_v17 }
  0x34   : > { %434 = vmatprep.subr.bf16.mxu0 %v809_v1  ;;  %503 = vmatprep.subr.bf16.mxu1 %v809_v1 }
  0x36   : > { %329 = vmatmul.mubr.bf16.vlgmr.msra.gmra.mrb[0].mxu0 %v215_v19 }
  0x37   : > { %435 = vmatpush1.bf16.msra.mxu0 %v950_v2  ;;  %466 = vmatprep.mubr.bf16.mxu0 %v898_v3 }
  0x38   : > { %436 = vmatprep.subr.bf16.mxu0 %v957_v4 }
  0x3b   : > { %437 = vmatpush1.bf16.msra.mxu0 %v963_v5 }
  0x3c   : > { %438 = vmatprep.subr.bf16.mxu0 %v970_v6 }
  0x3f   : > { %439 = vmatpush1.bf16.msra.mxu0 %v977_v7 }
  0x40   : > { %440 = vmatprep.subr.bf16.mxu0 %v984_v8 }
  0x43   : > { %441 = vmatpush1.bf16.msra.mxu0 %v991_v9 }
  0x44   : > { %442 = vmatprep.subr.bf16.mxu0 %v998_v10 }
  0x47   : > { %443 = vmatpush1.bf16.msra.mxu0 %v1005_v11 }
  0x48   : > { %444 = vmatprep.subr.bf16.mxu0 %v1012_v12 }
  0x4b   : > { %445 = vmatpush1.bf16.msra.mxu0 %v1019_v13 }
  0x4c   : > { %446 = vmatprep.subr.bf16.mxu0 %v1026_v14 }
  0x4f   : > { %447 = vmatpush1.bf16.msra.mxu0 %v1033_v15 }
  0x50   : > { %448 = vmatprep.subr.bf16.mxu0 %v1040_v16 }
  0x53   : > { %449 = vmatpush1.bf16.msra.mxu0 %v1047_v17 }
 0x109   : > { %v330_v22 = vpop.f32.mrb[0].mxu0 }
 0x10a   : > { %v337_v23 = vadd.f32 %v330_v22, %v213_v20  ;;  %v332_v24 = vpop.f32.mrb[1].mxu0 }
 0x10b   : > { %v338_v25 = vadd.f32 %v332_v24, %v214_v21  ;;  %v334_v26 = vpop.f32.mrb[2].mxu0 }
 0x10c   : > { %833 = vtanh.f32 %v337_v23  ;;  %v335_v27 = vpop.f32.mrb[3].mxu0  ;;  %v740_v33 = vmul.f32 -1.442695, %v337_v23 }
 0x10d   : > { %v741_v28 = vmul.f32 -1.442695, %v338_v25 }
 0x10f   : > { %835 = vpow2.f32 %v741_v28 }
 0x116   : > { %v834_v29 = vpop.eup %833 }
 0x117   : > { %352 = vrot.lane.b32.xlu0 %v834_v29, %s899_s5 }
 0x119   : > { %v836_v30 = vpop.eup %835 }
 0x11a   : > { %v349_v31 = vadd.f32 1.0, %v836_v30 }
 0x11c   : > { %837 = vrcp.f32 %v349_v31 }
 0x11d   : > { %839 = vpow2.f32 %v740_v33  ;;  %v751_v33 = vld [vmem:[%s941_s21 + $0x38] sm:$0xff] }
 0x126   : > { %v838_v32 = vpop.eup %837 }
 0x127   : > { %354 = vrot.lane.b32.xlu0 %v838_v32, %s899_s5  ;;  %v840_v34 = vpop.eup %839  ;;  %v356_v39 = vmul.f32 %v838_v32, %v212_v36  ;;  %v750_v32 = vld [vmem:[%s941_s21 + $0x30] sm:$0xff] }
 0x128   : > { %v342_v35 = vadd.f32 1.0, %v840_v34 }
 0x12a   : > { %841 = vrcp.f32 %v342_v35 }
 0x134   : > { %v842_v37 = vpop.eup %841 }
 0x189   : > { %v353_v38 = vpop.permute.xlu0 %352 }
 0x18a   : > { %v357_v40 = vmul.f32 %v842_v37, %v353_v38 }
 0x18c   : > { %v358_v41 = vadd.f32 %v357_v40, %v356_v39 }
 0x18e   : > { %843 = vtanh.f32 %v358_v41 }
 0x198   : > { %v844_v42 = vpop.eup %843 }
 0x199   : > { %v355_v43 = vpop.permute.xlu0 %354 }
 0x19a   : > { %v360_v44 = vmul.f32 %v844_v42, %v355_v43 }
 0x19c   : > { %v364_v45 = vpack.c.bf16 %v360_v44, %v360_v44 }
 0x19e   : > { %398 = vmatmul.mubr.bf16.vlgmr.msra.gmra.mrb[0].mxu1 %v364_v45 }
 0x19f   : > { %504 = vmatpush1.bf16.msra.mxu1 %v950_v2  ;;  %535 = vmatprep.mubr.bf16.mxu1 %v898_v3 }
 0x1a0   : > { %505 = vmatprep.subr.bf16.mxu1 %v957_v4 }
 0x1a3   : > { %506 = vmatpush1.bf16.msra.mxu1 %v963_v5 }
 0x1a4   : > { %507 = vmatprep.subr.bf16.mxu1 %v970_v6 }
 0x1a7   : > { %508 = vmatpush1.bf16.msra.mxu1 %v977_v7  ;;  %v746_v7 = vld [vmem:[%s941_s21 + $0x20] sm:$0xff] }
 0x1a8   : > { %509 = vmatprep.subr.bf16.mxu1 %v984_v8  ;;  %v747_v8 = vld [vmem:[%s941_s21 + $0x28] sm:$0xff] }
 0x1ab   : > { %510 = vmatpush1.bf16.msra.mxu1 %v991_v9 }
 0x1ac   : > { %511 = vmatprep.subr.bf16.mxu1 %v998_v10 }
 0x1af   : > { %512 = vmatpush1.bf16.msra.mxu1 %v1005_v11 }
 0x1b0   : > { %513 = vmatprep.subr.bf16.mxu1 %v1012_v12 }
 0x1b3   : > { %514 = vmatpush1.bf16.msra.mxu1 %v1019_v13 }
 0x1b4   : > { %515 = vmatprep.subr.bf16.mxu1 %v1026_v14 }
 0x1b7   : > { %516 = vmatpush1.bf16.msra.mxu1 %v1033_v15 }
 0x1b8   : > { %517 = vmatprep.subr.bf16.mxu1 %v1040_v16 }
 0x1bb   : > { %518 = vmatpush1.bf16.msra.mxu1 %v1047_v17 }
 0x271   : > { %v399_v48 = vpop.f32.mrb[0].mxu1 }
 0x272   : > { %v406_v49 = vadd.f32 %v742_v46, %v399_v48  ;;  %v401_v50 = vpop.f32.mrb[1].mxu1 }
 0x273   : > { %v407_v51 = vadd.f32 %v743_v47, %v401_v50  ;;  %v403_v52 = vpop.f32.mrb[2].mxu1 }
 0x274   : > { %845 = vtanh.f32 %v406_v49  ;;  %v404_v53 = vpop.f32.mrb[3].mxu1  ;;  %v744_v59 = vmul.f32 -1.442695, %v406_v49 }
 0x275   : > { %v745_v54 = vmul.f32 -1.442695, %v407_v51 }
 0x277   : > { %847 = vpow2.f32 %v745_v54 }
 0x27e   : > { %v846_v55 = vpop.eup %845 }
 0x27f   : > { %421 = vrot.lane.b32.xlu1 %v846_v55, %s899_s5 }
 0x281   : > { %v848_v56 = vpop.eup %847 }
 0x282   : > { %v418_v57 = vadd.f32 1.0, %v848_v56  ;;  %v881_v56 = vld [vmem:[%s1138_s2] sm:$0xff] (!%p754_p5)  }
 0x284   : > { %849 = vrcp.f32 %v418_v57  ;;  %v900_v57 = vmov (!%p754_p5), 0.0  }
 0x285   : > { %851 = vpow2.f32 %v744_v59  ;;  %776 = vmatprep.subr.bf16.mxu0 (!%p754_p5), %v900_v57  ;;  %v883_v59 = vld [vmem:[%s1138_s2 + $0x10] sm:$0xff] (!%p754_p5)  }
 0x28e   : > { %v850_v58 = vpop.eup %849 }
 0x28f   : > { %423 = vrot.lane.b32.xlu1 %v850_v58, %s899_s5  ;;  %v852_v60 = vpop.eup %851  ;;  %v425_v0 = vmul.f32 %v850_v58, %v358_v41  ;;  %v882_v58 = vld [vmem:[%s1138_s2 + $0x8] sm:$0xff] (!%p754_p5)  }
 0x290   : > { %v411_v61 = vadd.f32 1.0, %v852_v60  ;;  %v884_v60 = vld [vmem:[%s1138_s2 + $0x18] sm:$0xff] (!%p754_p5)  }
 0x292   : > { %853 = vrcp.f32 %v411_v61  ;;  %v885_v61 = vld [vmem:[%s1138_s2 + $0x20] sm:$0xff] (!%p754_p5)  }
 0x29c   : > { %v854_v62 = vpop.eup %853 }
 0x2f1   : > { %v422_v63 = vpop.permute.xlu1 %421 }
 0x2f2   : > { %v426_v1 = vmul.f32 %v854_v62, %v422_v63  ;;  %v886_v62 = vld [vmem:[%s1138_s2 + $0x28] sm:$0xff] (!%p754_p5)   ;;  %v887_v63 = vld [vmem:[%s1138_s2 + $0x30] sm:$0xff] (!%p754_p5)  }
 0x2f4   : > { %v427_v2 = vadd.f32 %v426_v1, %v425_v0  ;;  %v888_v0 = vld [vmem:[%s1138_s2 + $0x38] sm:$0xff] (!%p754_p5)  }
 0x2f6   : > { %855 = vtanh.f32 %v427_v2 }
 0x300   : > { %v856_v3 = vpop.eup %855 }
 0x301   : > { %v424_v4 = vpop.permute.xlu1 %423 }
 0x302   : > { %v429_v5 = vmul.f32 %v856_v3, %v424_v4 }
 0x304   : > { %v433_v6 = vpack.c.bf16 %v429_v5, %v429_v5 }
 0x306   : > { %467 = vmatmul.mubr.bf16.vlgmr.msra.gmra.mrb[4].mxu0 %v433_v6 }
 0x307   : > { %777 = vmatpush3.bf16.msra.mxu0 (!%p754_p5), %v881_v56  ;;  %792 = vmatprep.mubr.msk.bf16.mxu0 (!%p754_p5), %vm901_vm0, %v900_v57 }
 0x308   : > { %778 = vmatprep.subr.bf16.mxu0 (!%p754_p5), %v900_v57 }
 0x30b   : > { %779 = vmatpush3.bf16.msra.mxu0 (!%p754_p5), %v882_v58 }
 0x30c   : > { %780 = vmatprep.subr.bf16.mxu0 (!%p754_p5), %v900_v57 }
 0x30f   : > { %781 = vmatpush3.bf16.msra.mxu0 (!%p754_p5), %v883_v59 }
 0x310   : > { %782 = vmatprep.subr.bf16.mxu0 (!%p754_p5), %v900_v57 }
 0x313   : > { %783 = vmatpush3.bf16.msra.mxu0 (!%p754_p5), %v884_v60 }
 0x314   : > { %784 = vmatprep.subr.bf16.mxu0 (!%p754_p5), %v900_v57 }
 0x317   : > { %785 = vmatpush3.bf16.msra.mxu0 (!%p754_p5), %v885_v61 }
 0x318   : > { %786 = vmatprep.subr.bf16.mxu0 (!%p754_p5), %v900_v57 }
 0x31b   : > { %787 = vmatpush3.bf16.msra.mxu0 (!%p754_p5), %v886_v62 }
 0x31c   : > { %788 = vmatprep.subr.bf16.mxu0 (!%p754_p5), %v900_v57 }
 0x31f   : > { %789 = vmatpush3.bf16.msra.mxu0 (!%p754_p5), %v887_v63 }
 0x320   : > { %790 = vmatprep.subr.bf16.mxu0 (!%p754_p5), %v900_v57 }
 0x323   : > { %791 = vmatpush3.bf16.msra.mxu0 (!%p754_p5), %v888_v0 }
 0x3d9   : > { %v468_v9 = vpop.f32.mrb[4].mxu0 }
 0x3da   : > { %v475_v10 = vadd.f32 %v746_v7, %v468_v9  ;;  %v470_v11 = vpop.f32.mrb[5].mxu0 }
 0x3db   : > { %v476_v12 = vadd.f32 %v747_v8, %v470_v11  ;;  %v472_v13 = vpop.f32.mrb[6].mxu0 }
 0x3dc   : > { %857 = vtanh.f32 %v475_v10  ;;  %v473_v14 = vpop.f32.mrb[7].mxu0  ;;  %v748_v20 = vmul.f32 -1.442695, %v475_v10 }
 0x3dd   : > { %v749_v15 = vmul.f32 -1.442695, %v476_v12 }
 0x3df   : > { %859 = vpow2.f32 %v749_v15 }
 0x3e6   : > { %v858_v16 = vpop.eup %857 }
 0x3e7   : > { %490 = vrot.lane.b32.xlu0 %v858_v16, %s899_s5 }
 0x3e9   : > { %v860_v17 = vpop.eup %859 }
 0x3ea   : > { %v487_v18 = vadd.f32 1.0, %v860_v17 }
 0x3ec   : > { %861 = vrcp.f32 %v487_v18 }
 0x3ed   : > { %863 = vpow2.f32 %v748_v20 }
 0x3f6   : > { %v862_v19 = vpop.eup %861 }
 0x3f7   : > { %492 = vrot.lane.b32.xlu1 %v862_v19, %s899_s5  ;;  %v864_v21 = vpop.eup %863  ;;  %v494_v25 = vmul.f32 %v862_v19, %v427_v2  ;;  %v755_v2 = vld [vmem:[%s1139_s3] ss:$0 sm:$0xff] (!%p754_p5) }
 0x3f8   : > { %v480_v22 = vadd.f32 1.0, %v864_v21 }
 0x3fa   : > { %865 = vrcp.f32 %v480_v22 }
 0x404   : > { %v866_v23 = vpop.eup %865 }
 0x459   : > { %v491_v24 = vpop.permute.xlu0 %490 }
 0x45a   : > { %v495_v26 = vmul.f32 %v866_v23, %v491_v24 }
 0x45c   : > { %v496_v27 = vadd.f32 %v495_v26, %v494_v25 }
 0x45e   : > { %867 = vtanh.f32 %v496_v27 }
 0x468   : > { %v868_v28 = vpop.eup %867 }
 0x469   : > { %v493_v29 = vpop.permute.xlu1 %492 }
 0x46a   : > { %v498_v30 = vmul.f32 %v868_v28, %v493_v29 }
 0x46c   : > { %v502_v31 = vpack.c.bf16 %v498_v30, %v498_v30 }
 0x46e   : > { %536 = vmatmul.mubr.bf16.vlgmr.msra.gmra.mrb[4].mxu1 %v502_v31 }
 0x541   : > { %v537_v34 = vpop.f32.mrb[4].mxu1 }
 0x542   : > { %v544_v35 = vadd.f32 %v750_v32, %v537_v34  ;;  %v539_v36 = vpop.f32.mrb[5].mxu1 }
 0x543   : > { %v545_v37 = vadd.f32 %v751_v33, %v539_v36  ;;  %v541_v38 = vpop.f32.mrb[6].mxu1 }
 0x544   : > { %869 = vtanh.f32 %v544_v35  ;;  %v542_v39 = vpop.f32.mrb[7].mxu1  ;;  %v752_v45 = vmul.f32 -1.442695, %v544_v35 }
 0x545   : > { %v753_v40 = vmul.f32 -1.442695, %v545_v37 }
 0x547   : > { %871 = vpow2.f32 %v753_v40 }
 0x54e   : > { %v870_v41 = vpop.eup %869 }
 0x54f   : > { %559 = vrot.lane.b32.xlu0 %v870_v41, %s899_s5 }
 0x551   : > { %v872_v42 = vpop.eup %871 }
 0x552   : > { %v556_v43 = vadd.f32 1.0, %v872_v42 }
 0x554   : > { %873 = vrcp.f32 %v556_v43 }
 0x555   : > { %875 = vpow2.f32 %v752_v45 }
 0x55e   : > { %v874_v44 = vpop.eup %873 }
 0x55f   : > { %561 = vrot.lane.b32.xlu1 %v874_v44, %s899_s5  ;;  %v876_v46 = vpop.eup %875  ;;  %v563_v50 = vmul.f32 %v874_v44, %v496_v27 }
 0x560   : > { %v549_v47 = vadd.f32 1.0, %v876_v46 }
 0x562   : > { %877 = vrcp.f32 %v549_v47 }
 0x56c   : > { %v878_v48 = vpop.eup %877 }
 0x5c1   : > { %v560_v49 = vpop.permute.xlu0 %559 }
 0x5c2   : > { %v564_v51 = vmul.f32 %v878_v48, %v560_v49 }
 0x5c4   : > { %v565_v52 = vadd.f32 %v564_v51, %v563_v50 }
 0x5c6   : > { %879 = vtanh.f32 %v565_v52  ;;  %569 = vst [vmem:[#allocation3] sm:$0xff] %v565_v52 }
 0x5ce   : > { %573 = sbr.rel (%p754_p5) target bundleno = 1709 (0x6ad), region = 44 }
 0x5d0   : > { %v880_v53 = vpop.eup %879 }
 0x5d1   : > { %v562_v54 = vpop.permute.xlu1 %561 }
 0x5d2   : > { %v567_v55 = vmul.f32 %v880_v53, %v562_v54 }
 0x5d4   : > { %568 = vst [vmem:[#allocation2] sm:$0xff] %v567_v55  ;;  %v574_v1 = vpack.c.bf16 (!%p754_p5), %v567_v55, %v567_v55 }
 0x5d6   : > { %793 = vmatmul.mubr.bf16.vlgmr.msra.gmra.mrb[0].mxu0 %v574_v1 }
 0x6a9   : > { %v680_v3 = vpop.f32.mrb[0].mxu0 }
 0x6aa   : > { %v681_v4 = vadd.f32 %v755_v2, %v680_v3  ;;  %v794_v5 = vpop.f32.mrb[1].mxu0 }
 0x6ab   : > { %v683_v6 = vpop.f32.mrb[2].mxu0 }
 0x6ac   : > { %687 = vst.msk [vmem:[%s1140_s4] sm:$0xff] %vm686_vm1, %v681_v4  ;;  %v795_v7 = vpop.f32.mrb[3].mxu0 }
 0x6ad PF: > { %s14_s15 = sadd.s32 1, %s895_s15  }
 0x6ae   : > { %p11_p6 = scmp.ge.s32.totalorder %s14_s15, 4  }
 0x6b0   :  { %13 = sbr.rel (!%p11_p6) target bundleno = 1 (0x1), region = 73 }

</bundles_post_ra>
